<compile_context>
chip_gen: v7x
topology: tpu7x:2x2x1
jax: 0.10.0
libtpu: 0.0.40
codegen_flags: <defaults>
</compile_context>

<pallas_src>
import jax
import jax.numpy as jnp
from jax.experimental import pallas as pl
from jax.experimental.pallas import tpu as pltpu
import numpy as np


def _round_up(a, b):
    return -(-a // b) * b


def ccc_loss(x, y, *, tile_rows=8192, num_slices=2):
    """Pallas CCC loss: 1 - CCC(x, y).

    x, y: equal-size arrays of any shape / dtype (upcast to f32 per tile
    inside the kernel).  `tile_rows` is the row-tile size in f32-equivalent
    rows of the (rows, 128) lane-dense view (~4 MiB per block by default).
    `num_slices` is the number of independent partial reductions along the
    parallel grid axis (2 maps onto v7x's two TensorCores).
    """
    total = int(x.size)
    assert int(y.size) == total, "x and y must have the same number of elements"
    assert total >= 2, "CCC needs at least 2 elements (unbiased std)"

    isx = np.dtype(x.dtype).itemsize
    isy = np.dtype(y.dtype).itemsize
    # Sub-32-bit dtypes pack along sublanes; misaligned tiles trigger relayout
    # on the DMA path this kernel lives on.
    row_align = max(8, 32 // min(isx, isy))

    # Lane-dense (rows, 128) view, padded so the grid is exactly
    # num_slices * tiles_per_slice tiles of tile_r rows each.
    rows = _round_up(total, 128) // 128
    # tile_rows is expressed in f32-equivalent rows; scale up for narrower
    # dtypes so per-step HBM traffic stays constant.
    scale = max(1, 4 // max(isx, isy))
    max_tile_r = max(row_align, (tile_rows * scale // row_align) * row_align)
    tile_r = min(max_tile_r, _round_up(-(-rows // num_slices), row_align))
    tiles_per_slice = -(-rows // (num_slices * tile_r))
    rows_padded = num_slices * tiles_per_slice * tile_r

    tile_elems = tile_r * 128
    slice_elems = tiles_per_slice * tile_elems
    total_padded = rows_padded * 128
    # Tiles with linear index < boundary_tile are fully valid (fast path); the
    # boundary tile keeps `boundary_rem` valid elements; later tiles are pad.
    boundary_tile = total // tile_elems
    boundary_rem = total - boundary_tile * tile_elems
    counts = [float(min(max(total - s * slice_elems, 0), slice_elems))
              for s in range(num_slices)]

    def kernel(x_ref, y_ref, out_ref,
               sx_ref, sy_ref, sxx_ref, syy_ref, sxy_ref, shift_ref):
        s = pl.program_id(0)            # slice (parallel; one per TC on v7x)
        t = pl.program_id(1)            # tile within slice (arbitrary)
        lin = s * tiles_per_slice + t   # global tile index

        @pl.when(t == 0)
        def _init():
            # Coarse per-slice shift = mean of the slice's first tile. The
            # shifted-raw-moment form below is exact about the slice mean, so
            # the shift only has to be "near the data" to kill cancellation.
            shift_ref[0] = jnp.sum(x_ref[...].astype(jnp.float32)) / tile_elems
            shift_ref[1] = jnp.sum(y_ref[...].astype(jnp.float32)) / tile_elems
            z = jnp.zeros((8, 128), jnp.float32)
            sx_ref[...] = z
            sy_ref[...] = z
            sxx_ref[...] = z
            syy_ref[...] = z
            sxy_ref[...] = z

        cx = shift_ref[0]
        cy = shift_ref[1]

        def accumulate(xv, yv):
            # Full-vreg accumulation: (tile_r,128) -> (tile_r//8, 8, 128) and
            # sum over the leading (vreg-index) axis -> pure VALU adds, no XLU.
            xr = xv.reshape(tile_r // 8, 8, 128)
            yr = yv.reshape(tile_r // 8, 8, 128)
            sx_ref[...] += jnp.sum(xr, axis=0)
            sy_ref[...] += jnp.sum(yr, axis=0)
            sxx_ref[...] += jnp.sum(xr * xr, axis=0)
            syy_ref[...] += jnp.sum(yr * yr, axis=0)
            sxy_ref[...] += jnp.sum(xr * yr, axis=0)

        xs = x_ref[...].astype(jnp.float32) - cx
        ys = y_ref[...].astype(jnp.float32) - cy

        @pl.when(lin < boundary_tile)
        def _full_tile():
            accumulate(xs, ys)

        @pl.when(lin >= boundary_tile)
        def _tail_tile():
            # Boundary / fully-padded tiles: zero elements past the valid count.
            thresh = jnp.where(lin == boundary_tile, boundary_rem, 0)
            idx = (jax.lax.broadcasted_iota(jnp.int32, (tile_r, 128), 0) * 128
                   + jax.lax.broadcasted_iota(jnp.int32, (tile_r, 128), 1))
            valid = idx < thresh
            accumulate(jnp.where(valid, xs, 0.0), jnp.where(valid, ys, 0.0))

        @pl.when(t == tiles_per_slice - 1)
        def _finalize():
            # Per-slice stats about the *slice* mean (exact, shift-invariant):
            #   row0: n, row1: mean_x, row2: mean_y,
            #   row3: M2xx, row4: M2yy, row5: Mxy
            n_f = jnp.float32(counts[0])
            for k in range(1, num_slices):
                n_f = jnp.where(s == k, jnp.float32(counts[k]), n_f)
            inv_n = jnp.where(n_f > 0, 1.0 / n_f, 0.0)

            Sx = jnp.sum(sx_ref[...])
            Sy = jnp.sum(sy_ref[...])
            Sxx = jnp.sum(sxx_ref[...])
            Syy = jnp.sum(syy_ref[...])
            Sxy = jnp.sum(sxy_ref[...])

            mean_x = cx + Sx * inv_n
            mean_y = cy + Sy * inv_n
            m2x = Sxx - Sx * Sx * inv_n
            m2y = Syy - Sy * Sy * inv_n
            mxy = Sxy - Sx * Sy * inv_n

            row = jax.lax.broadcasted_iota(jnp.int32, (1, 8, 128), 1)
            stats_tile = jnp.where(row == 0, n_f, 0.0)
            stats_tile = jnp.where(row == 1, mean_x, stats_tile)
            stats_tile = jnp.where(row == 2, mean_y, stats_tile)
            stats_tile = jnp.where(row == 3, m2x, stats_tile)
            stats_tile = jnp.where(row == 4, m2y, stats_tile)
            stats_tile = jnp.where(row == 5, mxy, stats_tile)
            out_ref[...] = stats_tile

    # ---- wrapper-side data prep (native dtype; pad only when required) ----
    x2 = jnp.reshape(x, (-1,))
    y2 = jnp.reshape(y, (-1,))
    pad = total_padded - total
    if pad:
        # Zero padding; padded elements are masked out of every moment sum.
        x2 = jnp.pad(x2, (0, pad))
        y2 = jnp.pad(y2, (0, pad))
    x2 = x2.reshape(rows_padded, 128)
    y2 = y2.reshape(rows_padded, 128)

    # Double-buffered input blocks (+ headroom for internal scratch / output).
    in_block_bytes = tile_r * 128 * (isx + isy)
    vmem_limit = int(min(2 * in_block_bytes + (8 << 20), 112 << 20))

    cost = pl.CostEstimate(flops=10 * total,
                           transcendentals=4 * num_slices,
                           bytes_accessed=total_padded * (isx + isy))

    out = pl.pallas_call(
        kernel,
        out_shape=jax.ShapeDtypeStruct((num_slices, 8, 128), jnp.float32),
        grid=(num_slices, tiles_per_slice),
        in_specs=[
            pl.BlockSpec((tile_r, 128),
                         lambda s, t: (s * tiles_per_slice + t, 0)),
            pl.BlockSpec((tile_r, 128),
                         lambda s, t: (s * tiles_per_slice + t, 0)),
        ],
        out_specs=pl.BlockSpec((1, 8, 128), lambda s, t: (s, 0, 0)),
        scratch_shapes=[
            pltpu.VMEM((8, 128), jnp.float32),   # sum(x')
            pltpu.VMEM((8, 128), jnp.float32),   # sum(y')
            pltpu.VMEM((8, 128), jnp.float32),   # sum(x'^2)
            pltpu.VMEM((8, 128), jnp.float32),   # sum(y'^2)
            pltpu.VMEM((8, 128), jnp.float32),   # sum(x'*y')
            pltpu.SMEM((2,), jnp.float32),       # per-slice shift (cx, cy)
        ],
        compiler_params=pltpu.CompilerParams(
            dimension_semantics=("parallel", "arbitrary"),
            vmem_limit_bytes=vmem_limit),
        cost_estimate=cost,
    )(x2, y2)

    # ---- tiny JAX epilogue: Chan merge of per-slice stats + CCC algebra ----
    stats = out[:, :, 0]                          # (num_slices, 8)
    n_i = stats[:, 0]
    mx_i = stats[:, 1]
    my_i = stats[:, 2]
    m2x_i = stats[:, 3]
    m2y_i = stats[:, 4]
    mxy_i = stats[:, 5]

    n = jnp.float32(total)
    mean_x = jnp.sum(n_i * mx_i) / n
    mean_y = jnp.sum(n_i * my_i) / n
    dx = mx_i - mean_x
    dy = my_i - mean_y
    sxx = jnp.sum(m2x_i + n_i * dx * dx)
    syy = jnp.sum(m2y_i + n_i * dy * dy)
    sxy = jnp.sum(mxy_i + n_i * dx * dy)

    # Same eps placement as the torch module; torch.std is unbiased (ddof=1).
    rho = sxy / (jnp.sqrt(sxx) * jnp.sqrt(syy) + 1e-10)
    x_s = jnp.sqrt(sxx / (n - 1.0))
    y_s = jnp.sqrt(syy / (n - 1.0))
    ccc = (2.0 * rho * x_s * y_s
           / (x_s * x_s + y_s * y_s + (mean_x - mean_y) ** 2 + 1e-10))
    return 1.0 - ccc


def _ccc_loss_ref(x, y):
    """Pure-JAX reference mirroring the torch module."""
    x = x.astype(jnp.float32).ravel()
    y = y.astype(jnp.float32).ravel()
    x_m = jnp.mean(x)
    y_m = jnp.mean(y)
    vx = x - x_m
    vy = y - y_m
    rho = jnp.sum(vx * vy) / (
        jnp.sqrt(jnp.sum(vx ** 2)) * jnp.sqrt(jnp.sum(vy ** 2)) + 1e-10)
    x_s = jnp.std(x, ddof=1)
    y_s = jnp.std(y, ddof=1)
    ccc = 2 * rho * x_s * y_s / (x_s ** 2 + y_s ** 2 + (x_m - y_m) ** 2 + 1e-10)
    return 1 - ccc


if __name__ == "__main__":
    key = jax.random.PRNGKey(0)
    kx, ky, kz, kw = jax.random.split(key, 4)

    # Case 1: small prediction/target tensors with a nonzero mean. tile_rows=8
    # forces a multi-tile grid per slice, exercising init / accumulate /
    # finalize and the 2-slice parallel split + JAX merge epilogue.
    x1 = 2.0 * jax.random.normal(kx, (32, 128), dtype=jnp.float32) + 3.0
    y1 = 0.7 * x1 + 0.6 * jax.random.normal(ky, (32, 128), dtype=jnp.float32) - 0.5
    loss1 = jax.block_until_ready(ccc_loss(x1, y1, tile_rows=8))
    ref1 = jax.block_until_ready(_ccc_loss_ref(x1, y1))
    np.testing.assert_allclose(np.asarray(loss1), np.asarray(ref1),
                               rtol=2e-5, atol=2e-5)

    # Case 2: awkward element count (not a multiple of 128) exercising the
    # pad-to-tile + masked-tail path.
    x2 = jax.random.normal(kz, (3, 5, 7, 11), dtype=jnp.float32) * 1.5 + 2.0
    y2 = 0.5 * x2 + jax.random.normal(kw, (3, 5, 7, 11), dtype=jnp.float32)
    loss2 = jax.block_until_ready(ccc_loss(x2, y2))
    ref2 = jax.block_until_ready(_ccc_loss_ref(x2, y2))
    np.testing.assert_allclose(np.asarray(loss2), np.asarray(ref2),
                               rtol=2e-5, atol=2e-5)

    # TODO(synk): for multi-billion-element inputs, replace the per-slice
    # first-tile shift with a per-tile Welford/Chan merge for extra headroom.
    print("KERNEL_OK")
</pallas_src>

<mosaic_0001>
module attributes {stable_mosaic.version = 11 : i64} {
  func.func @kernel(%arg0: i32, %arg1: i32, %arg2: memref<8x128xf32, #tpu.memory_space<vmem>>, %arg3: memref<8x128xf32, #tpu.memory_space<vmem>>, %arg4: memref<1x8x128xf32, #tpu.memory_space<vmem>>, %arg5: memref<8x128xf32, #tpu.memory_space<vmem>>, %arg6: memref<8x128xf32, #tpu.memory_space<vmem>>, %arg7: memref<8x128xf32, #tpu.memory_space<vmem>>, %arg8: memref<8x128xf32, #tpu.memory_space<vmem>>, %arg9: memref<8x128xf32, #tpu.memory_space<vmem>>, %arg10: memref<2xf32, #tpu.memory_space<smem>>) attributes {dimension_semantics = [#tpu.dimension_semantics<parallel>, #tpu.dimension_semantics<arbitrary>], iteration_bounds = array<i64: 2, 2>, scalar_prefetch = 0 : i64, scratch_operands = 6 : i64, tpu.core_type = #tpu.core_type<tc>, window_params = [{transform_indices = @transform_0, window_bounds = array<i64: 8, 128>}, {transform_indices = @transform_1, window_bounds = array<i64: 8, 128>}, {transform_indices = @transform_2, window_bounds = array<i64: 1, 8, 128>}]} {
    %c2_i32 = arith.constant 2 : i32
    %0 = arith.muli %arg0, %c2_i32 : i32
    %1 = arith.addi %0, %arg1 : i32
    %c0_i32 = arith.constant 0 : i32
    %2 = arith.cmpi eq, %arg1, %c0_i32 : i32
    %3 = arith.extui %2 : i1 to i32
    %c0_i32_0 = arith.constant 0 : i32
    %4 = arith.cmpi ne, %3, %c0_i32_0 : i32
    scf.if %4 {
      %c0_9 = arith.constant 0 : index
      %c0_10 = arith.constant 0 : index
      %22 = vector.load %arg2[%c0_9, %c0_10] : memref<8x128xf32, #tpu.memory_space<vmem>>, vector<8x128xf32>
      %23 = vector.shape_cast %22 : vector<8x128xf32> to vector<1x8x128xf32>
      %cst = arith.constant dense<0.000000e+00> : vector<1xf32>
      %24 = vector.multi_reduction <add>, %23, %cst [1, 2] : vector<1x8x128xf32> to vector<1xf32>
      %25 = vector.shape_cast %24 : vector<1xf32> to vector<1x1x1xf32>
      %26 = vector.extract %25[0, 0, 0] : f32 from vector<1x1x1xf32>
      %cst_11 = arith.constant 1.024000e+03 : f32
      %27 = arith.divf %26, %cst_11 : f32
      %c0_12 = arith.constant 0 : index
      %28 = memref.load %arg10[%c0_12] : memref<2xf32, #tpu.memory_space<smem>>
      memref.store %27, %arg10[%c0_12] : memref<2xf32, #tpu.memory_space<smem>>
      %c0_13 = arith.constant 0 : index
      %c0_14 = arith.constant 0 : index
      %29 = vector.load %arg3[%c0_13, %c0_14] : memref<8x128xf32, #tpu.memory_space<vmem>>, vector<8x128xf32>
      %30 = vector.shape_cast %29 : vector<8x128xf32> to vector<1x8x128xf32>
      %cst_15 = arith.constant dense<0.000000e+00> : vector<1xf32>
      %31 = vector.multi_reduction <add>, %30, %cst_15 [1, 2] : vector<1x8x128xf32> to vector<1xf32>
      %32 = vector.shape_cast %31 : vector<1xf32> to vector<1x1x1xf32>
      %33 = vector.extract %32[0, 0, 0] : f32 from vector<1x1x1xf32>
      %cst_16 = arith.constant 1.024000e+03 : f32
      %34 = arith.divf %33, %cst_16 : f32
      %c1_17 = arith.constant 1 : index
      %35 = memref.load %arg10[%c1_17] : memref<2xf32, #tpu.memory_space<smem>>
      memref.store %34, %arg10[%c1_17] : memref<2xf32, #tpu.memory_space<smem>>
      %cst_18 = arith.constant 0.000000e+00 : f32
      %36 = vector.broadcast %cst_18 : f32 to vector<8x128xf32>
      %c0_19 = arith.constant 0 : index
      %c0_20 = arith.constant 0 : index
      %37 = vector.load %arg5[%c0_19, %c0_20] : memref<8x128xf32, #tpu.memory_space<vmem>>, vector<8x128xf32>
      tpu.vector_store %arg5[%c0_19, %c0_20], %36 {strides = array<i32>} : memref<8x128xf32, #tpu.memory_space<vmem>>, vector<8x128xf32>,
      %c0_21 = arith.constant 0 : index
      %c0_22 = arith.constant 0 : index
      %38 = vector.load %arg6[%c0_21, %c0_22] : memref<8x128xf32, #tpu.memory_space<vmem>>, vector<8x128xf32>
      tpu.vector_store %arg6[%c0_21, %c0_22], %36 {strides = array<i32>} : memref<8x128xf32, #tpu.memory_space<vmem>>, vector<8x128xf32>,
      %c0_23 = arith.constant 0 : index
      %c0_24 = arith.constant 0 : index
      %39 = vector.load %arg7[%c0_23, %c0_24] : memref<8x128xf32, #tpu.memory_space<vmem>>, vector<8x128xf32>
      tpu.vector_store %arg7[%c0_23, %c0_24], %36 {strides = array<i32>} : memref<8x128xf32, #tpu.memory_space<vmem>>, vector<8x128xf32>,
      %c0_25 = arith.constant 0 : index
      %c0_26 = arith.constant 0 : index
      %40 = vector.load %arg8[%c0_25, %c0_26] : memref<8x128xf32, #tpu.memory_space<vmem>>, vector<8x128xf32>
      tpu.vector_store %arg8[%c0_25, %c0_26], %36 {strides = array<i32>} : memref<8x128xf32, #tpu.memory_space<vmem>>, vector<8x128xf32>,
      %c0_27 = arith.constant 0 : index
      %c0_28 = arith.constant 0 : index
      %41 = vector.load %arg9[%c0_27, %c0_28] : memref<8x128xf32, #tpu.memory_space<vmem>>, vector<8x128xf32>
      tpu.vector_store %arg9[%c0_27, %c0_28], %36 {strides = array<i32>} : memref<8x128xf32, #tpu.memory_space<vmem>>, vector<8x128xf32>,
    } else {
    }
    %c0 = arith.constant 0 : index
    %5 = memref.load %arg10[%c0] : memref<2xf32, #tpu.memory_space<smem>>
    %c1 = arith.constant 1 : index
    %6 = memref.load %arg10[%c1] : memref<2xf32, #tpu.memory_space<smem>>
    %c0_1 = arith.constant 0 : index
    %c0_2 = arith.constant 0 : index
    %7 = vector.load %arg2[%c0_1, %c0_2] : memref<8x128xf32, #tpu.memory_space<vmem>>, vector<8x128xf32>
    %8 = vector.broadcast %5 : f32 to vector<8x128xf32>
    %9 = arith.subf %7, %8 : vector<8x128xf32>
    %c0_3 = arith.constant 0 : index
    %c0_4 = arith.constant 0 : index
    %10 = vector.load %arg3[%c0_3, %c0_4] : memref<8x128xf32, #tpu.memory_space<vmem>>, vector<8x128xf32>
    %11 = vector.broadcast %6 : f32 to vector<8x128xf32>
    %12 = arith.subf %10, %11 : vector<8x128xf32>
    %c4_i32 = arith.constant 4 : i32
    %13 = arith.cmpi slt, %1, %c4_i32 : i32
    %14 = arith.extui %13 : i1 to i32
    %c0_i32_5 = arith.constant 0 : i32
    %15 = arith.cmpi ne, %14, %c0_i32_5 : i32
    scf.if %15 {
      %22 = vector.shape_cast %9 : vector<8x128xf32> to vector<1x8x128xf32>
      %23 = vector.shape_cast %12 : vector<8x128xf32> to vector<1x8x128xf32>
      %c0_9 = arith.constant 0 : index
      %c0_10 = arith.constant 0 : index
      %24 = vector.load %arg5[%c0_9, %c0_10] : memref<8x128xf32, #tpu.memory_space<vmem>>, vector<8x128xf32>
      %cst = arith.constant dense<0.000000e+00> : vector<8x128xf32>
      %25 = vector.multi_reduction <add>, %22, %cst [0] : vector<1x8x128xf32> to vector<8x128xf32>
      %26 = arith.addf %24, %25 : vector<8x128xf32>
      %c0_11 = arith.constant 0 : index
      %c0_12 = arith.constant 0 : index
      %27 = vector.load %arg5[%c0_11, %c0_12] : memref<8x128xf32, #tpu.memory_space<vmem>>, vector<8x128xf32>
      tpu.vector_store %arg5[%c0_11, %c0_12], %26 {strides = array<i32>} : memref<8x128xf32, #tpu.memory_space<vmem>>, vector<8x128xf32>,
      %c0_13 = arith.constant 0 : index
      %c0_14 = arith.constant 0 : index
      %28 = vector.load %arg6[%c0_13, %c0_14] : memref<8x128xf32, #tpu.memory_space<vmem>>, vector<8x128xf32>
      %cst_15 = arith.constant dense<0.000000e+00> : vector<8x128xf32>
      %29 = vector.multi_reduction <add>, %23, %cst_15 [0] : vector<1x8x128xf32> to vector<8x128xf32>
      %30 = arith.addf %28, %29 : vector<8x128xf32>
      %c0_16 = arith.constant 0 : index
      %c0_17 = arith.constant 0 : index
      %31 = vector.load %arg6[%c0_16, %c0_17] : memref<8x128xf32, #tpu.memory_space<vmem>>, vector<8x128xf32>
      tpu.vector_store %arg6[%c0_16, %c0_17], %30 {strides = array<i32>} : memref<8x128xf32, #tpu.memory_space<vmem>>, vector<8x128xf32>,
      %c0_18 = arith.constant 0 : index
      %c0_19 = arith.constant 0 : index
      %32 = vector.load %arg7[%c0_18, %c0_19] : memref<8x128xf32, #tpu.memory_space<vmem>>, vector<8x128xf32>
      %33 = arith.mulf %22, %22 : vector<1x8x128xf32>
      %cst_20 = arith.constant dense<0.000000e+00> : vector<8x128xf32>
      %34 = vector.multi_reduction <add>, %33, %cst_20 [0] : vector<1x8x128xf32> to vector<8x128xf32>
      %35 = arith.addf %32, %34 : vector<8x128xf32>
      %c0_21 = arith.constant 0 : index
      %c0_22 = arith.constant 0 : index
      %36 = vector.load %arg7[%c0_21, %c0_22] : memref<8x128xf32, #tpu.memory_space<vmem>>, vector<8x128xf32>
      tpu.vector_store %arg7[%c0_21, %c0_22], %35 {strides = array<i32>} : memref<8x128xf32, #tpu.memory_space<vmem>>, vector<8x128xf32>,
      %c0_23 = arith.constant 0 : index
      %c0_24 = arith.constant 0 : index
      %37 = vector.load %arg8[%c0_23, %c0_24] : memref<8x128xf32, #tpu.memory_space<vmem>>, vector<8x128xf32>
      %38 = arith.mulf %23, %23 : vector<1x8x128xf32>
      %cst_25 = arith.constant dense<0.000000e+00> : vector<8x128xf32>
      %39 = vector.multi_reduction <add>, %38, %cst_25 [0] : vector<1x8x128xf32> to vector<8x128xf32>
      %40 = arith.addf %37, %39 : vector<8x128xf32>
      %c0_26 = arith.constant 0 : index
      %c0_27 = arith.constant 0 : index
      %41 = vector.load %arg8[%c0_26, %c0_27] : memref<8x128xf32, #tpu.memory_space<vmem>>, vector<8x128xf32>
      tpu.vector_store %arg8[%c0_26, %c0_27], %40 {strides = array<i32>} : memref<8x128xf32, #tpu.memory_space<vmem>>, vector<8x128xf32>,
      %c0_28 = arith.constant 0 : index
      %c0_29 = arith.constant 0 : index
      %42 = vector.load %arg9[%c0_28, %c0_29] : memref<8x128xf32, #tpu.memory_space<vmem>>, vector<8x128xf32>
      %43 = arith.mulf %22, %23 : vector<1x8x128xf32>
      %cst_30 = arith.constant dense<0.000000e+00> : vector<8x128xf32>
      %44 = vector.multi_reduction <add>, %43, %cst_30 [0] : vector<1x8x128xf32> to vector<8x128xf32>
      %45 = arith.addf %42, %44 : vector<8x128xf32>
      %c0_31 = arith.constant 0 : index
      %c0_32 = arith.constant 0 : index
      %46 = vector.load %arg9[%c0_31, %c0_32] : memref<8x128xf32, #tpu.memory_space<vmem>>, vector<8x128xf32>
      tpu.vector_store %arg9[%c0_31, %c0_32], %45 {strides = array<i32>} : memref<8x128xf32, #tpu.memory_space<vmem>>, vector<8x128xf32>,
    } else {
    }
    %c4_i32_6 = arith.constant 4 : i32
    %16 = arith.cmpi sge, %1, %c4_i32_6 : i32
    %17 = arith.extui %16 : i1 to i32
    %c0_i32_7 = arith.constant 0 : i32
    %18 = arith.cmpi ne, %17, %c0_i32_7 : i32
    scf.if %18 {
      %c4_i32_9 = arith.constant 4 : i32
      %22 = arith.cmpi eq, %1, %c4_i32_9 : i32
      %c0_i32_10 = arith.constant 0 : i32
      %c0_i32_11 = arith.constant 0 : i32
      %23 = arith.select %22, %c0_i32_10, %c0_i32_11 : i32
      %24 = tpu.iota {dimensions = array<i32: 0>} : vector<8x128xi32>
      %c128_i32 = arith.constant 128 : i32
      %25 = vector.broadcast %c128_i32 : i32 to vector<8x128xi32>
      %26 = arith.muli %24, %25 : vector<8x128xi32>
      %27 = tpu.iota {dimensions = array<i32: 1>} : vector<8x128xi32>
      %28 = arith.addi %26, %27 : vector<8x128xi32>
      %29 = vector.broadcast %23 : i32 to vector<8x128xi32>
      %30 = arith.cmpi slt, %28, %29 : vector<8x128xi32>
      %cst = arith.constant 0.000000e+00 : f32
      %31 = vector.broadcast %cst : f32 to vector<8x128xf32>
      %32 = arith.select %30, %9, %31 : vector<8x128xi1>, vector<8x128xf32>
      %cst_12 = arith.constant 0.000000e+00 : f32
      %33 = vector.broadcast %cst_12 : f32 to vector<8x128xf32>
      %34 = arith.select %30, %12, %33 : vector<8x128xi1>, vector<8x128xf32>
      %35 = vector.shape_cast %32 : vector<8x128xf32> to vector<1x8x128xf32>
      %36 = vector.shape_cast %34 : vector<8x128xf32> to vector<1x8x128xf32>
      %c0_13 = arith.constant 0 : index
      %c0_14 = arith.constant 0 : index
      %37 = vector.load %arg5[%c0_13, %c0_14] : memref<8x128xf32, #tpu.memory_space<vmem>>, vector<8x128xf32>
      %cst_15 = arith.constant dense<0.000000e+00> : vector<8x128xf32>
      %38 = vector.multi_reduction <add>, %35, %cst_15 [0] : vector<1x8x128xf32> to vector<8x128xf32>
      %39 = arith.addf %37, %38 : vector<8x128xf32>
      %c0_16 = arith.constant 0 : index
      %c0_17 = arith.constant 0 : index
      %40 = vector.load %arg5[%c0_16, %c0_17] : memref<8x128xf32, #tpu.memory_space<vmem>>, vector<8x128xf32>
      tpu.vector_store %arg5[%c0_16, %c0_17], %39 {strides = array<i32>} : memref<8x128xf32, #tpu.memory_space<vmem>>, vector<8x128xf32>,
      %c0_18 = arith.constant 0 : index
      %c0_19 = arith.constant 0 : index
      %41 = vector.load %arg6[%c0_18, %c0_19] : memref<8x128xf32, #tpu.memory_space<vmem>>, vector<8x128xf32>
      %cst_20 = arith.constant dense<0.000000e+00> : vector<8x128xf32>
      %42 = vector.multi_reduction <add>, %36, %cst_20 [0] : vector<1x8x128xf32> to vector<8x128xf32>
      %43 = arith.addf %41, %42 : vector<8x128xf32>
      %c0_21 = arith.constant 0 : index
      %c0_22 = arith.constant 0 : index
      %44 = vector.load %arg6[%c0_21, %c0_22] : memref<8x128xf32, #tpu.memory_space<vmem>>, vector<8x128xf32>
      tpu.vector_store %arg6[%c0_21, %c0_22], %43 {strides = array<i32>} : memref<8x128xf32, #tpu.memory_space<vmem>>, vector<8x128xf32>,
      %c0_23 = arith.constant 0 : index
      %c0_24 = arith.constant 0 : index
      %45 = vector.load %arg7[%c0_23, %c0_24] : memref<8x128xf32, #tpu.memory_space<vmem>>, vector<8x128xf32>
      %46 = arith.mulf %35, %35 : vector<1x8x128xf32>
      %cst_25 = arith.constant dense<0.000000e+00> : vector<8x128xf32>
      %47 = vector.multi_reduction <add>, %46, %cst_25 [0] : vector<1x8x128xf32> to vector<8x128xf32>
      %48 = arith.addf %45, %47 : vector<8x128xf32>
      %c0_26 = arith.constant 0 : index
      %c0_27 = arith.constant 0 : index
      %49 = vector.load %arg7[%c0_26, %c0_27] : memref<8x128xf32, #tpu.memory_space<vmem>>, vector<8x128xf32>
      tpu.vector_store %arg7[%c0_26, %c0_27], %48 {strides = array<i32>} : memref<8x128xf32, #tpu.memory_space<vmem>>, vector<8x128xf32>,
      %c0_28 = arith.constant 0 : index
      %c0_29 = arith.constant 0 : index
      %50 = vector.load %arg8[%c0_28, %c0_29] : memref<8x128xf32, #tpu.memory_space<vmem>>, vector<8x128xf32>
      %51 = arith.mulf %36, %36 : vector<1x8x128xf32>
      %cst_30 = arith.constant dense<0.000000e+00> : vector<8x128xf32>
      %52 = vector.multi_reduction <add>, %51, %cst_30 [0] : vector<1x8x128xf32> to vector<8x128xf32>
      %53 = arith.addf %50, %52 : vector<8x128xf32>
      %c0_31 = arith.constant 0 : index
      %c0_32 = arith.constant 0 : index
      %54 = vector.load %arg8[%c0_31, %c0_32] : memref<8x128xf32, #tpu.memory_space<vmem>>, vector<8x128xf32>
      tpu.vector_store %arg8[%c0_31, %c0_32], %53 {strides = array<i32>} : memref<8x128xf32, #tpu.memory_space<vmem>>, vector<8x128xf32>,
      %c0_33 = arith.constant 0 : index
      %c0_34 = arith.constant 0 : index
      %55 = vector.load %arg9[%c0_33, %c0_34] : memref<8x128xf32, #tpu.memory_space<vmem>>, vector<8x128xf32>
      %56 = arith.mulf %35, %36 : vector<1x8x128xf32>
      %cst_35 = arith.constant dense<0.000000e+00> : vector<8x128xf32>
      %57 = vector.multi_reduction <add>, %56, %cst_35 [0] : vector<1x8x128xf32> to vector<8x128xf32>
      %58 = arith.addf %55, %57 : vector<8x128xf32>
      %c0_36 = arith.constant 0 : index
      %c0_37 = arith.constant 0 : index
      %59 = vector.load %arg9[%c0_36, %c0_37] : memref<8x128xf32, #tpu.memory_space<vmem>>, vector<8x128xf32>
      tpu.vector_store %arg9[%c0_36, %c0_37], %58 {strides = array<i32>} : memref<8x128xf32, #tpu.memory_space<vmem>>, vector<8x128xf32>,
    } else {
    }
    %c1_i32 = arith.constant 1 : i32
    %19 = arith.cmpi eq, %arg1, %c1_i32 : i32
    %20 = arith.extui %19 : i1 to i32
    %c0_i32_8 = arith.constant 0 : i32
    %21 = arith.cmpi ne, %20, %c0_i32_8 : i32
    scf.if %21 {
      %c1_i32_9 = arith.constant 1 : i32
      %22 = arith.cmpi eq, %arg0, %c1_i32_9 : i32
      %cst = arith.constant 2.048000e+03 : f32
      %cst_10 = arith.constant 2.048000e+03 : f32
      %23 = arith.select %22, %cst, %cst_10 : f32
      %cst_11 = arith.constant 0.000000e+00 : f32
      %24 = arith.cmpf ogt, %23, %cst_11 : f32
      %cst_12 = arith.constant 1.000000e+00 : f32
      %25 = arith.divf %cst_12, %23 : f32
      %cst_13 = arith.constant 0.000000e+00 : f32
      %26 = arith.select %24, %25, %cst_13 : f32
      %c0_14 = arith.constant 0 : index
      %c0_15 = arith.constant 0 : index
      %27 = vector.load %arg5[%c0_14, %c0_15] : memref<8x128xf32, #tpu.memory_space<vmem>>, vector<8x128xf32>
      %28 = vector.shape_cast %27 : vector<8x128xf32> to vector<1x8x128xf32>
      %cst_16 = arith.constant dense<0.000000e+00> : vector<1xf32>
      %29 = vector.multi_reduction <add>, %28, %cst_16 [1, 2] : vector<1x8x128xf32> to vector<1xf32>
      %30 = vector.shape_cast %29 : vector<1xf32> to vector<1x1x1xf32>
      %31 = vector.extract %30[0, 0, 0] : f32 from vector<1x1x1xf32>
      %c0_17 = arith.constant 0 : index
      %c0_18 = arith.constant 0 : index
      %32 = vector.load %arg6[%c0_17, %c0_18] : memref<8x128xf32, #tpu.memory_space<vmem>>, vector<8x128xf32>
      %33 = vector.shape_cast %32 : vector<8x128xf32> to vector<1x8x128xf32>
      %cst_19 = arith.constant dense<0.000000e+00> : vector<1xf32>
      %34 = vector.multi_reduction <add>, %33, %cst_19 [1, 2] : vector<1x8x128xf32> to vector<1xf32>
      %35 = vector.shape_cast %34 : vector<1xf32> to vector<1x1x1xf32>
      %36 = vector.extract %35[0, 0, 0] : f32 from vector<1x1x1xf32>
      %c0_20 = arith.constant 0 : index
      %c0_21 = arith.constant 0 : index
      %37 = vector.load %arg7[%c0_20, %c0_21] : memref<8x128xf32, #tpu.memory_space<vmem>>, vector<8x128xf32>
      %38 = vector.shape_cast %37 : vector<8x128xf32> to vector<1x8x128xf32>
      %cst_22 = arith.constant dense<0.000000e+00> : vector<1xf32>
      %39 = vector.multi_reduction <add>, %38, %cst_22 [1, 2] : vector<1x8x128xf32> to vector<1xf32>
      %40 = vector.shape_cast %39 : vector<1xf32> to vector<1x1x1xf32>
      %41 = vector.extract %40[0, 0, 0] : f32 from vector<1x1x1xf32>
      %c0_23 = arith.constant 0 : index
      %c0_24 = arith.constant 0 : index
      %42 = vector.load %arg8[%c0_23, %c0_24] : memref<8x128xf32, #tpu.memory_space<vmem>>, vector<8x128xf32>
      %43 = vector.shape_cast %42 : vector<8x128xf32> to vector<1x8x128xf32>
      %cst_25 = arith.constant dense<0.000000e+00> : vector<1xf32>
      %44 = vector.multi_reduction <add>, %43, %cst_25 [1, 2] : vector<1x8x128xf32> to vector<1xf32>
      %45 = vector.shape_cast %44 : vector<1xf32> to vector<1x1x1xf32>
      %46 = vector.extract %45[0, 0, 0] : f32 from vector<1x1x1xf32>
      %c0_26 = arith.constant 0 : index
      %c0_27 = arith.constant 0 : index
      %47 = vector.load %arg9[%c0_26, %c0_27] : memref<8x128xf32, #tpu.memory_space<vmem>>, vector<8x128xf32>
      %48 = vector.shape_cast %47 : vector<8x128xf32> to vector<1x8x128xf32>
      %cst_28 = arith.constant dense<0.000000e+00> : vector<1xf32>
      %49 = vector.multi_reduction <add>, %48, %cst_28 [1, 2] : vector<1x8x128xf32> to vector<1xf32>
      %50 = vector.shape_cast %49 : vector<1xf32> to vector<1x1x1xf32>
      %51 = vector.extract %50[0, 0, 0] : f32 from vector<1x1x1xf32>
      %52 = arith.mulf %31, %26 : f32
      %53 = arith.addf %5, %52 : f32
      %54 = arith.mulf %36, %26 : f32
      %55 = arith.addf %6, %54 : f32
      %56 = arith.mulf %31, %31 : f32
      %57 = arith.mulf %56, %26 : f32
      %58 = arith.subf %41, %57 : f32
      %59 = arith.mulf %36, %36 : f32
      %60 = arith.mulf %59, %26 : f32
      %61 = arith.subf %46, %60 : f32
      %62 = arith.mulf %31, %36 : f32
      %63 = arith.mulf %62, %26 : f32
      %64 = arith.subf %51, %63 : f32
      %65 = tpu.iota {dimensions = array<i32: 1>} : vector<1x8x128xi32>
      %c0_i32_29 = arith.constant 0 : i32
      %66 = vector.broadcast %c0_i32_29 : i32 to vector<1x8x128xi32>
      %67 = arith.cmpi eq, %65, %66 : vector<1x8x128xi32>
      %cst_30 = arith.constant 0.000000e+00 : f32
      %68 = vector.broadcast %23 : f32 to vector<1x8x128xf32>
      %69 = vector.broadcast %cst_30 : f32 to vector<1x8x128xf32>
      %70 = arith.select %67, %68, %69 : vector<1x8x128xi1>, vector<1x8x128xf32>
      %c1_i32_31 = arith.constant 1 : i32
      %71 = vector.broadcast %c1_i32_31 : i32 to vector<1x8x128xi32>
      %72 = arith.cmpi eq, %65, %71 : vector<1x8x128xi32>
      %73 = vector.broadcast %53 : f32 to vector<1x8x128xf32>
      %74 = arith.select %72, %73, %70 : vector<1x8x128xi1>, vector<1x8x128xf32>
      %c2_i32_32 = arith.constant 2 : i32
      %75 = vector.broadcast %c2_i32_32 : i32 to vector<1x8x128xi32>
      %76 = arith.cmpi eq, %65, %75 : vector<1x8x128xi32>
      %77 = vector.broadcast %55 : f32 to vector<1x8x128xf32>
      %78 = arith.select %76, %77, %74 : vector<1x8x128xi1>, vector<1x8x128xf32>
      %c3_i32 = arith.constant 3 : i32
      %79 = vector.broadcast %c3_i32 : i32 to vector<1x8x128xi32>
      %80 = arith.cmpi eq, %65, %79 : vector<1x8x128xi32>
      %81 = vector.broadcast %58 : f32 to vector<1x8x128xf32>
      %82 = arith.select %80, %81, %78 : vector<1x8x128xi1>, vector<1x8x128xf32>
      %c4_i32_33 = arith.constant 4 : i32
      %83 = vector.broadcast %c4_i32_33 : i32 to vector<1x8x128xi32>
      %84 = arith.cmpi eq, %65, %83 : vector<1x8x128xi32>
      %85 = vector.broadcast %61 : f32 to vector<1x8x128xf32>
      %86 = arith.select %84, %85, %82 : vector<1x8x128xi1>, vector<1x8x128xf32>
      %c5_i32 = arith.constant 5 : i32
      %87 = vector.broadcast %c5_i32 : i32 to vector<1x8x128xi32>
      %88 = arith.cmpi eq, %65, %87 : vector<1x8x128xi32>
      %89 = vector.broadcast %64 : f32 to vector<1x8x128xf32>
      %90 = arith.select %88, %89, %86 : vector<1x8x128xi1>, vector<1x8x128xf32>
      %c0_34 = arith.constant 0 : index
      %c0_35 = arith.constant 0 : index
      %c0_36 = arith.constant 0 : index
      %91 = vector.load %arg4[%c0_34, %c0_35, %c0_36] : memref<1x8x128xf32, #tpu.memory_space<vmem>>, vector<1x8x128xf32>
      tpu.vector_store %arg4[%c0_34, %c0_35, %c0_36], %90 {strides = array<i32>} : memref<1x8x128xf32, #tpu.memory_space<vmem>>, vector<1x8x128xf32>,
    } else {
    }
    return
  }
  func.func @transform_0(%arg0: i32, %arg1: i32) -> (i32, i32) {
    %c2_i32 = arith.constant 2 : i32
    %0 = arith.muli %arg0, %c2_i32 : i32
    %1 = arith.addi %0, %arg1 : i32
    %c0_i32 = arith.constant 0 : i32
    %c0_i32_0 = arith.constant 0 : i32
    return %1, %c0_i32 : i32, i32
  }
  func.func @transform_1(%arg0: i32, %arg1: i32) -> (i32, i32) {
    %c2_i32 = arith.constant 2 : i32
    %0 = arith.muli %arg0, %c2_i32 : i32
    %1 = arith.addi %0, %arg1 : i32
    %c0_i32 = arith.constant 0 : i32
    %c0_i32_0 = arith.constant 0 : i32
    return %1, %c0_i32 : i32, i32
  }
  func.func @transform_2(%arg0: i32, %arg1: i32) -> (i32, i32, i32) {
    %c0_i32 = arith.constant 0 : i32
    %c0_i32_0 = arith.constant 0 : i32
    %c0_i32_1 = arith.constant 0 : i32
    return %arg0, %c0_i32, %c0_i32_0 : i32, i32, i32
  }
}

</mosaic_0001>

<bundles_post_ra>
// kernel: tpu_custom_call.1
= control target key start
LH: loop header
LB: loop body
LE: loop exit
PB: predicated region body
PF: predicated region fallthrough
CT: control target
= control target key end

     0   :  { %s1204_s0 = inlined_call_operand.hbm [shape: f32[32,128], index: 0, kind: input, shape index: {}]   ;;  %s1205_s1 = inlined_call_operand.hbm [shape: f32[32,128], index: 1, kind: input, shape index: {}]   ;;  %s1206_s2 = inlined_call_operand.hbm [shape: f32[2,8,128], index: 2, kind: output, shape index: {}]  }
   0x1   :  { %1215 = sst [smem:[#allocation20_spill]] %s1204_s0 }
   0x2   :  { %1216 = sst [smem:[#allocation21_spill]] %s1205_s1 }
   0x3   :  { %7 = vsyncpa [#allocation9], 0 }
   0x4   :  { %9 = vsyncpa [#allocation9 + $0x1], 0 }
   0x5   :  { %10 = vsyncpa [#allocation12], 0 }
   0x6   :  { %12 = vsyncpa [#allocation12 + $0x1], 0 }
   0x7   :  { %13 = vsyncpa [#allocation10], 0 }
   0x8   :  { %15 = vsyncpa [#allocation10 + $0x1], 0  ;;  %s904_s9 = smov 0   ;;  %s906_s10 = smov 0  }
   0x9   :  { %s908_s11 = smov 0   ;;  %s910_s12 = smov 0  }
   0xa   :  { %s912_s13 = smov 0   ;;  %s914_s14 = smov 0  }
   0xb   :  { %s916_s15 = smov 0   ;;  %s918_s16 = smov 0  }
   0xc   :  { %s920_s17 = smov 0   ;;  %s922_s18 = smov 0  }
   0xd   :  { %s924_s19 = smov 0  }
   0xe LB: > { %1217 = sst [smem:[#allocation17_spill]] %s878_s18  ;;  %s545_s20 = sadd.s32 4294967295, %s882_s19   ;;  %s882_s19 = sphi %s924_s19, %s21_s19   ;;  %s878_s18 = sphi %s922_s18, %s1241_s18   ;;  %s874_s17 = sphi %s920_s17, %s1249_s17   ;;  %s870_s16 = sphi %s918_s16, %s1239_s16   ;;  %s866_s15 = sphi %s916_s15, %s1248_s15   ;;  %s862_s14 = sphi %s914_s14, %s1247_s14   ;;  %s858_s13 = sphi %s912_s13, %s1246_s13   ;;  %s854_s12 = sphi %s910_s12, %s1245_s12   ;;  %s850_s11 = sphi %s908_s11, %s1244_s11   ;;  %s846_s10 = sphi %s906_s10, %s1243_s10   ;;  %s842_s9 = sphi %s904_s9, %s1242_s9  }
   0xf   : > { %s546_s21 = sadd.s32 4294967294, %s882_s19   ;;  %s30_s22 = sadd.s32 1, %s874_s17 }
  0x10   : > { %s33_s23 = sadd.s32 1, %s878_s18  ;;  %p31_p0 = scmp.ge.s32.totalorder %s30_s22, 2 }
  0x11   : > { %s547_s24 = sshll.u32 %s878_s18, 1  ;;  %s44_s26 = sadd.s32 1, %s862_s14 }
  0x12   : > { %s963_s25 = sadd.s32 %s874_s17, %s547_s24  ;;  %s1251_s22 = smov (%p31_p0, %s30_s22), 0 }
  0x13   : > { %1218 = sst [smem:[#allocation18_spill]] %s1251_s22  ;;  %s1253_s23 = smov (!%p31_p0, %s33_s23), %s878_s18 }
  0x14   : > { %p51_p1 = scmp.ne.s32.totalorder %s862_s14, %s858_s13  ;;  %p52_p2 = scmp.eq.s32.totalorder %s882_s19, 0 }
  0x15   : > { %p35_p3 = scmp.ge.s32.totalorder %s1253_s23, 2  ;;  %p57_p4 = scmp.ne.s32.totalorder %s858_s13, %s854_s12 }
  0x16   : > { %p973_p5 = por %p52_p2, %p51_p1  ;;  %p58_p6 = scmp.eq.s32.totalorder %s545_s20, 0 }
  0x17   : > { %s1255_s23 = smov (%p35_p3, %s1253_s23), 0  ;;  %s100_s29 = sadd.s32 1, %s850_s11 }
  0x18   : > { %1220 = sst [smem:[#allocation19_spill]] %s1255_s23  ;;  %p979_p7 = por %p58_p6, %p57_p4 }
  0x19   : > { %s548_s30 = sshll.u32 %s1255_s23, 1  ;;  %s97_s3 = ssub.s32 %s878_s18, %s1255_s23 }
  0x1a   : > { %s1221_s28 = scalar_select %p979_p7, 1, 0 }
  0x1b   : > { %s40_s4 = sadd.s32 %s548_s30, %s1251_s22  ;;  %p98_p8 = scmp.eq.s32.totalorder %s97_s3, 0 }
  0x1c   : > { %s41_s5 = ssub.s32 %s963_s25, %s40_s4  ;;  %p110_p9 = scmp.ne.s32.totalorder %s850_s11, %s846_s10 }
  0x1d   : > { %p42_p10 = scmp.eq.s32.totalorder %s41_s5, 0  ;;  %p111_p11 = scmp.eq.s32.totalorder %s545_s20, 3 }
  0x1e   : > { %s992_s6 = scalar_select %p98_p8, %s850_s11, %s100_s29  }
  0x1f   : > { %s995_s7 = scalar_select %p42_p10, %s862_s14, %s44_s26  }
  0x20   : > { %p997_p12 = por %p111_p11, %p110_p9  ;;  %p116_p13 = scmp.ne.s32.totalorder %s846_s10, %s842_s9 }
  0x21   : > { %p117_p0 = scmp.eq.s32.totalorder %s546_s21, 3  ;;  %p604_p1 = scmp.lt.s32.totalorder %s882_s19, 4 }
  0x22   : > { %s1222_s8 = scalar_select %p997_p12, 1, 0 }
  0x23   : > { %s1007_s12 = sand.u32 1, %s862_s14   ;;  %p1009_p2 = por %p117_p0, %p116_p13 }
  0x24   : > { %s1207_s24 = sshll.u32 %s1007_s12, 3  ;;  %s1208_s26 = sshll.u32 %s963_s25, 7 }
  0x25   : > { %s1223_s20 = scalar_select %p1009_p2, 1, 0 }
  0x26   : > { %s1224_s0 = sld [smem:[#allocation20_spill]]  ;;  %s141_s21 = scalar_lea.vmem [#allocation8], %s1207_s24 }
  0x27   : > { %s150_s4 = sshll.u32 %s141_s21, 4  ;;  %p1026_p3 = pnand %p604_p1, %p973_p5  ;;  %s1030_s4 = int_to_ptr.vmem [resolvable:$true] %s150_s4 }
  0x28   : > { %s138_s29 = scalar_lea.sflag [#allocation9], %s1007_s12 }
  0x29   : > { %p698_p9 = pneg %p1026_p3 }
  0x2c   : > { %s1020_s3 = scalar_lea.hbm %s1224_s0, %s1208_s26  ;;  %s701_s24 = scalar_lea.hbm %s1224_s0, 512 }
  0x2d   : > { %s696_s30 = scalar_lea.hbm %s1020_s3, 128  ;;  %p702_p5 = scmp.lt.u32.totalorder %s1020_s3, %s1224_s0 }
  0x2e   : > { %p697_p8 = scmp.ne.s32.totalorder %s1020_s3, %s696_s30  ;;  %p703_p13 = scmp.lt.u32.totalorder %s701_s24, %s696_s30 }
  0x2f   : > { %p705_p1 = scmp.lt.u32.totalorder %s696_s30, %s1020_s3 }
  0x30   : > { %p699_p10 = pnand %p698_p9, %p697_p8  ;;  %p704_p0 = por %p703_p13, %p702_p5 }
  0x32   : > { %p700_p11 = pneg %p699_p10  ;;  %p706_p4 = por %p705_p1, %p704_p0 }
  0x34   : > { %p707_p6 = pnand %p706_p4, %p700_p11 }
  0x36   : > { %710 = shalt.err (!%p707_p6)
}
  0x37   : > { %s711_s22 = scalar_lea.vmem %s1030_s4, 128  ;;  %s884_s27 = smov [#allocation8]  }
  0x38   : > { %p712_p8 = scmp.ne.s32.totalorder %s1030_s4, %s711_s22  ;;  %s716_s21 = sshll.u32 %s884_s27, 4  ;;  %s717_s21 = int_to_ptr.vmem [resolvable:$false] %s716_s21 }
  0x39   : > { %s718_s23 = scalar_lea.vmem %s717_s21, 256  ;;  %p719_p12 = scmp.lt.s32.totalorder %s1030_s4, %s717_s21 }
  0x3a   : > { %p714_p10 = pnand %p712_p8, %p698_p9  ;;  %p720_p5 = scmp.lt.s32.totalorder %s718_s23, %s711_s22 }
  0x3c   : > { %p715_p2 = pneg %p714_p10  ;;  %p721_p13 = por %p720_p5, %p719_p12 }
  0x3e   : > { %p722_p0 = pnand %p721_p13, %p715_p2 }
  0x40   : > { %725 = shalt.err (!%p722_p0)
}
  0x41   : > { %596 = dma.hbm_to_vmem [thread:$0]  (!%p1026_p3), %s1020_s3, 128, %s1030_s4, %s138_s29  }
  0x42   : > { %p1226_p4 = scmp.lt.s32.totalorder %s882_s19, 5  ;;  %p1227_p6 = scmp.ge.s32.totalorder %s882_s19, 1 }
  0x43   : > { %s1229_s22 = sshll.u32 %s963_s25, 7  ;;  %s1230_s1 = sld [smem:[#allocation21_spill]] }
  0x44   : > { %p1064_p11 = pnand %p1227_p6, %p1226_p4  ;;  %s1231_s21 = sshll.u32 %s1007_s12, 3 }
  0x45   : > { %s161_s23 = scalar_lea.vmem [#allocation11], %s1231_s21  ;;  %s158_s3 = scalar_lea.sflag [#allocation12], %s1007_s12 }
  0x46   : > { %s1228_s24 = scalar_select %p1064_p11, 1, 0 }
  0x47   : > { %s170_s0 = sshll.u32 %s161_s23, 4  ;;  %s171_s0 = int_to_ptr.vmem [resolvable:$true] %s170_s0 }
  0x49   : > { %s1073_s27 = scalar_lea.hbm %s1230_s1, %s1229_s22  ;;  %s731_s22 = scalar_lea.hbm %s1230_s1, 512 }
  0x4a   : > { %s726_s4 = scalar_lea.hbm %s1073_s27, 128  ;;  %p732_p8 = scmp.lt.u32.totalorder %s1073_s27, %s1230_s1 }
  0x4b   : > { %p727_p12 = scmp.ne.s32.totalorder %s1073_s27, %s726_s4  ;;  %p733_p10 = scmp.lt.u32.totalorder %s731_s22, %s726_s4 }
  0x4c   : > { %p735_p13 = scmp.lt.u32.totalorder %s726_s4, %s1073_s27 }
  0x4d   : > { %p729_p2 = pnand %p727_p12, %p698_p9  ;;  %p734_p5 = por %p733_p10, %p732_p8 }
  0x4f   : > { %p730_p1 = pneg %p729_p2  ;;  %p736_p0 = por %p735_p13, %p734_p5 }
  0x51   : > { %p737_p4 = pnand %p736_p0, %p730_p1 }
  0x53   : > { %740 = shalt.err (!%p737_p4)
}
  0x54   : > { %s741_s12 = scalar_lea.vmem %s171_s0, 128  ;;  %s885_s21 = smov [#allocation11]  }
  0x55   : > { %p742_p6 = scmp.ne.s32.totalorder %s171_s0, %s741_s12  ;;  %s746_s23 = sshll.u32 %s885_s21, 4  ;;  %s747_s23 = int_to_ptr.vmem [resolvable:$false] %s746_s23 }
  0x56   : > { %s748_s25 = scalar_lea.vmem %s747_s23, 256  ;;  %p749_p7 = scmp.lt.s32.totalorder %s171_s0, %s747_s23 }
  0x57   : > { %p744_p12 = pnand %p742_p6, %p698_p9  ;;  %p750_p11 = scmp.lt.s32.totalorder %s748_s25, %s741_s12 }
  0x59   : > { %p745_p2 = pneg %p744_p12  ;;  %p751_p8 = por %p750_p11, %p749_p7 }
  0x5b   : > { %p752_p10 = pnand %p751_p8, %p745_p2 }
  0x5d   : > { %755 = shalt.err (!%p752_p10)
}
  0x5e   : > { %599 = dma.hbm_to_vmem [thread:$0]  (!%p1026_p3), %s1073_s27, 128, %s171_s0, %s158_s3  }
  0x5f   : > { %p1232_p1 = scmp.ne.s32.totalorder %s1228_s24, 0 }
  0x60   : > { %s181_s4 = sand.u32 (!%p1232_p1), 1, %s858_s13   ;;  %p1233_p9 = scmp.ne.s32.totalorder (!%p1232_p1), %s1221_s28, 0 }
  0x61   : > { %179 = sbr.rel (%p1232_p1) target bundleno = 604 (0x25c), region = 28  ;;  %s560_s29 = sshll.u32 (!%p1232_p1), %s181_s4, 3 }
  0x62   : > { %s182_s22 = scalar_lea.sflag (!%p1232_p1), [#allocation9], %s181_s4  ;;  %s1100_s26 = scalar_lea.vmem (!%p1232_p1), [#allocation8], %s560_s29 }
  0x68   : > { %829 = dma.done.wait (%p1233_p9), %s182_s22, 128  }
  0x69   : > { %831 = vsyncadd (%p1233_p9), %s182_s22, 4294967168  ;;  %s191_s30 = scalar_lea.sflag [#allocation12], %s181_s4  ;;  %s1106_s5 = scalar_lea.vmem [#allocation11], %s560_s29 }
  0x6a   : > { %833 = dma.done.wait (%p1233_p9), %s191_s30, 128  }
  0x6b   : > { %835 = vsyncadd (%p1233_p9), %s191_s30, 4294967168  ;;  %s1213_s0 = sand.u32 1, %s846_s10   ;;  %s563_s24 = sshll.u32 %s870_s16, 1 }
  0x6c   : > { %s1116_s27 = sshll.u32 %s1213_s0, 3  ;;  %s1119_s3 = sadd.s32 %s866_s15, %s563_s24 }
  0x6d   : > { %p564_p7 = scmp.ne.s32.totalorder %s866_s15, 0 }
  0x6e   : > { %v230_v0 = vld [vmem:[%s1100_s26] sm:$0xff] (!%p564_p7)  ;;  %v245_v1 = vld [vmem:[%s1106_s5] sm:$0xff] (!%p564_p7)  ;;  %v886_v2 = vmov (!%p564_p7), 0.0  }
  0x6f   : > { %229 = sbr.rel (%p564_p7) target bundleno = 322 (0x142), region = 40  ;;  %231 = vadd.xlane.f32.xlu0 (!%p564_p7), %v230_v0  ;;  %260 = vst [vmem:[#allocation2] sm:$0xff] (!%p564_p7), %v886_v2  ;;  %261 = vst [vmem:[#allocation3] sm:$0xff] (!%p564_p7), %v886_v2 }
  0x70   : > { %262 = vst [vmem:[#allocation4] sm:$0xff] (!%p564_p7), %v886_v2  ;;  %263 = vst [vmem:[#allocation5] sm:$0xff] (!%p564_p7), %v886_v2 }
  0x71   : > { %264 = vst [vmem:[#allocation6] sm:$0xff] (!%p564_p7), %v886_v2 }
  0x73   : > { %246 = vadd.xlane.f32.xlu0 (!%p564_p7), %v245_v1 }
  0xfc   : > { %v232_v3 = vpop.xlane.xlu0 %231 }
  0xfd   : > { %v233_v4 = vrot.slane %v232_v3, 4 }
  0xff   : > { %v234_v5 = vadd.f32 %v233_v4, %v232_v3 }
 0x100   : > { %v247_v6 = vpop.xlane.xlu0 %246 }
 0x101   : > { %v235_v7 = vrot.slane %v234_v5, 2  ;;  %v248_v8 = vrot.slane %v247_v6, 4 }
 0x103   : > { %v249_v9 = vadd.f32 %v248_v8, %v247_v6  ;;  %v236_v10 = vadd.f32 %v235_v7, %v234_v5 }
 0x105   : > { %v250_v11 = vrot.slane %v249_v9, 2  ;;  %v237_v12 = vrot.slane %v236_v10, 1 }
 0x107   : > { %v251_v13 = vadd.f32 %v250_v11, %v249_v9  ;;  %v238_v14 = vadd.f32 %v237_v12, %v236_v10 }
 0x109   : > { %573 = vpush %v238_v14  ;;  %v252_v15 = vrot.slane %v251_v13, 1 }
 0x10b   : > { %v253_v16 = vadd.f32 %v252_v15, %v251_v13 }
 0x10d   : > { %575 = vpush %v253_v16 }
 0x13a   : > { %s574_s28 = spop %573 }
 0x13b   : > { %s242_s21 = smul.f32 0.0009765625, %s574_s28 }
 0x13d   : > { %244 = sst [smem:[#allocation7]] %s242_s21 }
 0x13e   : > { %s576_s23 = spop %575 }
 0x13f   : > { %s257_s25 = smul.f32 0.0009765625, %s576_s23 }
 0x141   : > { %259 = sst [smem:[#allocation7 + $0x1]] %s257_s25 }
 0x142 PF: > { %s1125_s4 = sld [smem:[#allocation7]]  ;;  %s1127_s29 = sld [smem:[#allocation7 + $0x1]]  ;;  %v267_v17 = vld [vmem:[%s1100_s26] sm:$0xff]  ;;  %v270_v18 = vld [vmem:[%s1106_s5] sm:$0xff] }
 0x143   : > { %p566_p3 = scmp.ge.s32.totalorder %s1119_s3, 4 }
 0x144   : > { %v277_v23 = vld [vmem:[#allocation2] sm:$0xff] (!%p566_p3)  ;;  %v281_v24 = vld [vmem:[#allocation3] sm:$0xff] (!%p566_p3)  ;;  %v285_v25 = vld [vmem:[#allocation4] sm:$0xff] (!%p566_p3) }
 0x145   : > { %276 = sbr.rel (%p566_p3) target bundleno = 337 (0x151), region = 44  ;;  %v290_v31 = vld [vmem:[#allocation5] sm:$0xff] (!%p566_p3)  ;;  %v295_v32 = vld [vmem:[#allocation6] sm:$0xff] (!%p566_p3) }
 0x148   : > { %v268_v19 = vstv %s1125_s4  ;;  %v271_v20 = vstv %s1127_s29 }
 0x149   : > { %v269_v21 = vsub.f32 %v267_v17, %v268_v19  ;;  %v272_v22 = vsub.f32 %v270_v18, %v271_v20 }
 0x14b   : > { %v286_v26 = vmul.f32 (!%p566_p3), %v269_v21, %v269_v21  ;;  %v291_v27 = vmul.f32 (!%p566_p3), %v272_v22, %v272_v22  ;;  %v296_v28 = vmul.f32 (!%p566_p3), %v272_v22, %v269_v21  ;;  %v279_v29 = vadd.f32 (!%p566_p3), %v277_v23, %v269_v21 }
 0x14c   : > { %v283_v30 = vadd.f32 %v281_v24, %v272_v22 }
 0x14d   : > { %v288_v33 = vadd.f32 %v286_v26, %v285_v25  ;;  %v293_v34 = vadd.f32 %v291_v27, %v290_v31  ;;  %v298_v35 = vadd.f32 %v296_v28, %v295_v32  ;;  %280 = vst [vmem:[#allocation2] sm:$0xff] %v279_v29 }
 0x14e   : > { %284 = vst [vmem:[#allocation3] sm:$0xff] %v283_v30 }
 0x14f   : > { %289 = vst [vmem:[#allocation4] sm:$0xff] %v288_v33  ;;  %294 = vst [vmem:[#allocation5] sm:$0xff] %v293_v34 }
 0x150   : > { %299 = vst [vmem:[#allocation6] sm:$0xff] %v298_v35 }
 0x151 PF: > { %p567_p11 = scmp.lt.s32.totalorder %s1119_s3, 4 }
 0x152   : > { %v304_v36 = vlaneseq (!%p567_p11) }
 0x153   : > { %303 = sbr.rel (%p567_p11) target bundleno = 354 (0x162), region = 48 }
 0x154   : > { %v305_v37 = vshrl.u32 (!%p567_p11), %v304_v36, 7  ;;  %v308_v38 = vand.u32 (!%p567_p11), 127, %v304_v36  ;;  %v313_v41 = vld [vmem:[#allocation2] sm:$0xff] (!%p567_p11) }
 0x155   : > { %v317_v42 = vld [vmem:[#allocation3] sm:$0xff] (!%p567_p11) }
 0x156   : > { %v306_v39 = vmul.u32 (!%p567_p11), 128, %v305_v37  ;;  %v321_v45 = vld [vmem:[#allocation4] sm:$0xff] (!%p567_p11)  ;;  %v326_v46 = vld [vmem:[#allocation5] sm:$0xff] (!%p567_p11) }
 0x157   : > { %v331_v51 = vld [vmem:[#allocation6] sm:$0xff] (!%p567_p11) }
 0x158   : > { %v309_v40 = vadd.s32 (!%p567_p11), %v308_v38, %v306_v39 }
 0x15a   : > { %vm310_vm0 = vcmp.lt.s32.totalorder %v309_v40, 0 }
 0x15b   : > { %v311_v43 = vsel %vm310_vm0, %v269_v21, 0.0  ;;  %v312_v44 = vsel %vm310_vm0, %v272_v22, 0.0 }
 0x15c   : > { %v315_v47 = vadd.f32 %v313_v41, %v311_v43  ;;  %v319_v48 = vadd.f32 %v317_v42, %v312_v44  ;;  %v322_v49 = vmul.f32 %v311_v43, %v311_v43  ;;  %v327_v50 = vmul.f32 %v312_v44, %v312_v44 }
 0x15d   : > { %v332_v52 = vmul.f32 %v312_v44, %v311_v43 }
 0x15e   : > { %316 = vst [vmem:[#allocation2] sm:$0xff] %v315_v47  ;;  %320 = vst [vmem:[#allocation3] sm:$0xff] %v319_v48  ;;  %v324_v53 = vadd.f32 %v322_v49, %v321_v45  ;;  %v329_v54 = vadd.f32 %v327_v50, %v326_v46 }
 0x15f   : > { %v334_v55 = vadd.f32 %v332_v52, %v331_v51 }
 0x160   : > { %325 = vst [vmem:[#allocation4] sm:$0xff] %v324_v53  ;;  %330 = vst [vmem:[#allocation5] sm:$0xff] %v329_v54 }
 0x161   : > { %335 = vst [vmem:[#allocation6] sm:$0xff] %v334_v55 }
 0x162 PF: > { %p568_p5 = scmp.ne.s32.totalorder %s866_s15, 1 }
 0x163   : > { %v403_v32 = vlaneseq (!%p568_p5)  ;;  %v887_v34 = vmov (!%p568_p5), 0.0  }
 0x164   : > { %339 = sbr.rel (%p568_p5) target bundleno = 578 (0x242), region = 52 }
 0x165   : > { %v340_v57 = vld [vmem:[#allocation2] sm:$0xff] (!%p568_p5)  ;;  %v350_v59 = vld [vmem:[#allocation3] sm:$0xff] (!%p568_p5)  ;;  %v404_v33 = vshrl.u32 (!%p568_p5), %v403_v32, 7 }
 0x166   : > { %341 = vadd.xlane.f32.xlu0 (!%p568_p5), %v340_v57 }
 0x167   : > { %v360_v56 = vld [vmem:[#allocation4] sm:$0xff] (!%p568_p5)  ;;  %v370_v58 = vld [vmem:[#allocation5] sm:$0xff] (!%p568_p5)  ;;  %vm405_vm1 = vcmp.eq.s32.totalorder (!%p568_p5), %v404_v33, 0  ;;  %vm407_vm2 = vcmp.eq.s32.totalorder (!%p568_p5), %v404_v33, 1  ;;  %vm410_vm3 = vcmp.eq.s32.totalorder (!%p568_p5), %v404_v33, 2  ;;  %vm413_vm4 = vcmp.eq.s32.totalorder (!%p568_p5), %v404_v33, 3 }
 0x168   : > { %361 = vadd.xlane.f32.xlu1 (!%p568_p5), %v360_v56  ;;  %v380_v60 = vld [vmem:[#allocation6] sm:$0xff] (!%p568_p5)  ;;  %v406_v35 = vsel (!%p568_p5), %vm405_vm1, 2048.0, %v887_v34  ;;  %vm416_vm5 = vcmp.eq.s32.totalorder (!%p568_p5), %v404_v33, 4  ;;  %vm419_vm6 = vcmp.eq.s32.totalorder (!%p568_p5), %v404_v33, 5 }
 0x16a   : > { %351 = vadd.xlane.f32.xlu0 (!%p568_p5), %v350_v59 }
 0x16c   : > { %371 = vadd.xlane.f32.xlu1 %v370_v58 }
 0x16e   : > { %381 = vadd.xlane.f32.xlu0 %v380_v60 }
 0x1f3   : > { %v342_v62 = vpop.xlane.xlu0 %341 }
 0x1f4   : > { %v343_v0 = vrot.slane %v342_v62, 4 }
 0x1f5   : > { %v362_v61 = vpop.xlane.xlu1 %361 }
 0x1f6   : > { %v363_v63 = vrot.slane %v362_v61, 4  ;;  %v344_v2 = vadd.f32 %v343_v0, %v342_v62 }
 0x1f7   : > { %v352_v4 = vpop.xlane.xlu0 %351 }
 0x1f8   : > { %v364_v1 = vadd.f32 %v363_v63, %v362_v61  ;;  %v345_v6 = vrot.slane %v344_v2, 2  ;;  %v353_v8 = vrot.slane %v352_v4, 4 }
 0x1f9   : > { %v372_v3 = vpop.xlane.xlu1 %371 }
 0x1fa   : > { %v365_v5 = vrot.slane %v364_v1, 2  ;;  %v373_v7 = vrot.slane %v372_v3, 4  ;;  %v354_v10 = vadd.f32 %v353_v8, %v352_v4  ;;  %v346_v11 = vadd.f32 %v345_v6, %v344_v2 }
 0x1fb   : > { %v382_v12 = vpop.xlane.xlu0 %381 }
 0x1fc   : > { %v374_v9 = vadd.f32 %v373_v7, %v372_v3  ;;  %v366_v13 = vadd.f32 %v365_v5, %v364_v1  ;;  %v355_v15 = vrot.slane %v354_v10, 2  ;;  %v383_v16 = vrot.slane %v382_v12, 4 }
 0x1fd   : > { %v347_v17 = vrot.slane %v346_v11, 1 }
 0x1fe   : > { %v375_v14 = vrot.slane %v374_v9, 2  ;;  %v384_v19 = vadd.f32 %v383_v16, %v382_v12  ;;  %v356_v21 = vadd.f32 %v355_v15, %v354_v10  ;;  %v367_v22 = vrot.slane %v366_v13, 1 }
 0x1ff   : > { %v348_v20 = vadd.f32 %v347_v17, %v346_v11 }
 0x200   : > { %v376_v18 = vadd.f32 %v375_v14, %v374_v9  ;;  %v385_v23 = vrot.slane %v384_v19, 2  ;;  %v357_v24 = vrot.slane %v356_v21, 1  ;;  %v368_v29 = vadd.f32 %v367_v22, %v366_v13 }
 0x201   : > { %577 = vpush %v348_v20 }
 0x202   : > { %v377_v25 = vrot.slane %v376_v18, 1  ;;  %v386_v26 = vadd.f32 %v385_v23, %v384_v19  ;;  %v358_v27 = vadd.f32 %v357_v24, %v356_v21 }
 0x204   : > { %v378_v28 = vadd.f32 %v377_v25, %v376_v18  ;;  %579 = vpush %v358_v27  ;;  %v387_v30 = vrot.slane %v386_v26, 1 }
 0x205   : > { %581 = vpush %v368_v29 }
 0x206   : > { %583 = vpush %v378_v28  ;;  %v388_v31 = vadd.f32 %v387_v30, %v386_v26 }
 0x208   : > { %585 = vpush %v388_v31 }
 0x232   : > { %s578_s15 = spop %577 }
 0x233   : > { %s390_s22 = smul.f32 0.00048828125, %s578_s15 }
 0x234   : > { %s394_s26 = smul.f32 %s578_s15, %s578_s15 }
 0x235   : > { %s391_s30 = sadd.f32 %s390_s22, %s1125_s4  ;;  %s580_s5 = spop %579 }
 0x236   : > { %s395_s24 = smul.f32 0.00048828125, %s394_s26  ;;  %s582_s28 = spop %581 }
 0x237   : > { %s392_s3 = smul.f32 0.00048828125, %s580_s5  ;;  %v408_v36 = vstv %s391_s30  ;;  %s584_s0 = spop %583 }
 0x238   : > { %s396_s21 = ssub.f32 %s582_s28, %s395_s24  ;;  %s397_s25 = smul.f32 %s580_s5, %s580_s5  ;;  %v409_v37 = vsel %vm407_vm2, %v408_v36, %v406_v35 }
 0x239   : > { %s393_s23 = sadd.f32 %s1127_s29, %s392_s3  ;;  %s400_s12 = smul.f32 %s580_s5, %s578_s15 }
 0x23a   : > { %s398_s4 = smul.f32 0.00048828125, %s397_s25  ;;  %s586_s22 = spop %585  ;;  %v414_v40 = vstv %s396_s21 }
 0x23b   : > { %v411_v38 = vstv %s393_s23  ;;  %s401_s26 = smul.f32 0.00048828125, %s400_s12  ;;  %s1234_s29 = scalar_lea.vmem [#allocation13], %s1116_s27 }
 0x23c   : > { %v412_v39 = vsel %vm410_vm3, %v411_v38, %v409_v37  ;;  %s399_s1 = ssub.f32 %s584_s0, %s398_s4 }
 0x23d   : > { %v415_v41 = vsel %vm413_vm4, %v414_v40, %v412_v39  ;;  %s402_s18 = ssub.f32 %s586_s22, %s401_s26 }
 0x23e   : > { %v417_v42 = vstv %s399_s1 }
 0x23f   : > { %v418_v43 = vsel %vm416_vm5, %v417_v42, %v415_v41  ;;  %v420_v44 = vstv %s402_s18 }
 0x240   : > { %v421_v45 = vsel %vm419_vm6, %v420_v44, %v418_v43 }
 0x241   : > { %422 = vst [vmem:[%s1234_s29] sm:$0xff] %v421_v45 }
 0x242 PF: > { %s570_s15 = sshll.u32 %s870_s16, 7  ;;  %s1235_s0 = scalar_lea.vmem [#allocation13], %s1116_s27 }
 0x243   : > { %s1144_s12 = scalar_lea.hbm %s1206_s2, %s570_s15  ;;  %s437_s24 = sshll.u32 %s1235_s0, 4  ;;  %s438_s24 = int_to_ptr.vmem [resolvable:$true] %s437_s24 }
 0x244   : > { %s1236_s1 = sand.u32 1, %s846_s10   ;;  %s756_s18 = scalar_lea.vmem %s438_s24, 128 }
 0x245   : > { %s424_s3 = scalar_lea.sflag [#allocation10], %s1236_s1  ;;  %p757_p13 = scmp.ne.s32.totalorder %s438_s24, %s756_s18 }
 0x246   : > { %p1237_p0 = scmp.ne.s32.totalorder %s1222_s8, 0  ;;  %s888_s28 = smov [#allocation13]  }
 0x247   : > { %s760_s21 = sshll.u32 %s888_s28, 4  ;;  %s761_s21 = int_to_ptr.vmem [resolvable:$false] %s760_s21 }
 0x248   : > { %p758_p4 = pnand %p757_p13, %p1237_p0  ;;  %s762_s23 = scalar_lea.vmem %s761_s21, 256 }
 0x249   : > { %p763_p12 = scmp.lt.s32.totalorder %s438_s24, %s761_s21  ;;  %p764_p2 = scmp.lt.s32.totalorder %s762_s23, %s756_s18 }
 0x24a   : > { %p759_p6 = pneg %p758_p4 }
 0x24b   : > { %p765_p8 = por %p764_p2, %p763_p12 }
 0x24d   : > { %p766_p10 = pnand %p765_p8, %p759_p6 }
 0x24f   : > { %769 = shalt.err (!%p766_p10)
}
 0x250   : > { %s770_s16 = scalar_lea.hbm %s1144_s12, 128  ;;  %s774_s4 = scalar_lea.hbm %s1206_s2, 256 }
 0x251   : > { %p771_p1 = scmp.ne.s32.totalorder %s1144_s12, %s770_s16  ;;  %p775_p3 = scmp.lt.u32.totalorder %s1144_s12, %s1206_s2 }
 0x252   : > { %p776_p11 = scmp.lt.u32.totalorder %s774_s4, %s770_s16  ;;  %p778_p13 = scmp.lt.u32.totalorder %s770_s16, %s1144_s12 }
 0x253   : > { %p772_p9 = pnand %p771_p1, %p1237_p0 }
 0x254   : > { %p777_p5 = por %p776_p11, %p775_p3 }
 0x255   : > { %p773_p7 = pneg %p772_p9 }
 0x256   : > { %p779_p4 = por %p778_p13, %p777_p5 }
 0x258   : > { %p780_p6 = pnand %p779_p4, %p773_p7 }
 0x25a   : > { %783 = shalt.err (!%p780_p6)
}
 0x25b   : > { %591 = dma.vmem_to_hbm [thread:$0]  (%p1237_p0), %s438_s24, 128, %s1144_s12, %s424_s3  }
 0x25c PF: > { %p605_p12 = scmp.ge.s32.totalorder %s882_s19, 2  ;;  %s449_s29 = sand.u32 1, %s842_s9  }
 0x25d   : > { %p1238_p2 = scmp.ne.s32.totalorder %s1223_s20, 0  ;;  %s450_s15 = scalar_lea.sflag [#allocation10], %s449_s29 }
 0x25f   : > { %p601_p8 = pnand %p605_p12, %p1238_p2 }
 0x261   : > { %837 = dma.done.wait (!%p601_p8), %s450_s15, 128  }
 0x262   : > { %839 = vsyncadd (!%p601_p8), %s450_s15, 4294967168  ;;  %s21_s19 = sadd.s32 1, %s882_s19   ;;  %s1239_s16 = sld [smem:[#allocation17_spill]] }
 0x263   : > { %p18_p10 = scmp.ge.s32.totalorder %s21_s19, 6   ;;  %s1240_s8 = sld [smem:[#allocation18_spill]] }
 0x264   : > { %s1241_s18 = sld [smem:[#allocation19_spill]]  ;;  %s1242_s9 = smov %s846_s10 }
 0x265   : > { %s1243_s10 = smov %s850_s11  ;;  %s1244_s11 = smov %s992_s6 }
 0x266   : > { %s1245_s12 = smov %s858_s13  ;;  %s1246_s13 = smov %s862_s14 }
 0x267   : > { %s1247_s14 = smov %s995_s7  ;;  %s1248_s15 = smov %s874_s17 }
 0x268   :  { %20 = sbr.rel (!%p18_p10) target bundleno = 14 (0xe), region = 104 }
 0x269   : > { %s1249_s17 = smov %s1240_s8 }
 0x26f   :  { %455 = vsyncpa [#allocation9], 1 }
 0x270   :  { %457 = vsyncpa [#allocation9 + $0x1], 1 }
 0x271   :  { %458 = vsyncpa [#allocation12], 1 }
 0x272   :  { %460 = vsyncpa [#allocation12 + $0x1], 1 }
 0x273   :  { %461 = vsyncpa [#allocation10], 1 }
 0x274   :  { %463 = vsyncpa [#allocation10 + $0x1], 1 }

</bundles_post_ra>
